<compile_context>
chip_gen: v5e
topology: v5e:2x2
jax: 0.10.0
libtpu: 0.0.40
codegen_flags: <defaults>
</compile_context>

<pallas_src>
import jax
import jax.numpy as jnp
from jax.experimental import pallas as pl
from jax.experimental.pallas import tpu as pltpu

INPUT_FEATURES = 13
OUTPUT_FEATURES = 1


def _blr_kernel(xt_ref, w_ref, b_ref, o_ref):
    # xt_ref: (F, TILE_B)  features on sublanes, batch on lanes (lane-dense)
    # w_ref : (F, 1)       weight column, lane-broadcast on the VPU
    # b_ref : (1, 1)       bias scalar in SMEM
    # o_ref : (1, TILE_B)  lane-dense output slab
    prod = xt_ref[...] * w_ref[...]                  # VPU elementwise (F, TILE_B)
    y = jnp.sum(prod, axis=0, keepdims=True)         # sublane reduce -> (1, TILE_B)
    o_ref[...] = (y + b_ref[0, 0]).astype(o_ref.dtype)


def bayesian_linear_forward(x, w, b, *, tile_b=512):
    """x: (B, F) f32, w: (O, F) f32 with O==1, b: (O,) f32  ->  (B, O) f32"""
    B, F = x.shape
    O = w.shape[0]
    assert O == OUTPUT_FEATURES == 1, "kernel specialized for output_features=1"

    # Pick a lane-dense batch tile: >=512 rows at scale, one 128-lane tile minimum.
    if B <= tile_b:
        tile_b = max(128, ((B + 127) // 128) * 128)
    b_pad = pl.cdiv(B, tile_b) * tile_b

    # Layout plumbing in the wrapper (cheap XLA ops): feature-major, batch padded
    # up to the tile so every output store is an unmasked full-lane vst.
    xt = jnp.pad(x, ((0, b_pad - B), (0, 0))).T          # (F, b_pad)
    w_col = w.reshape(F, 1)                              # (F, 1)
    b_smem = b.reshape(1, 1)                             # (1, 1) scalar for SMEM

    out = pl.pallas_call(
        _blr_kernel,
        out_shape=jax.ShapeDtypeStruct((1, b_pad), x.dtype),
        grid=(b_pad // tile_b,),
        in_specs=[
            pl.BlockSpec((F, tile_b), lambda i: (0, i)),          # x tile (VMEM)
            pl.BlockSpec((F, 1), lambda i: (0, 0)),               # weight column
            pl.BlockSpec((1, 1), lambda i: (0, 0),
                         memory_space=pltpu.MemorySpace.SMEM),    # bias scalar
        ],
        out_specs=pl.BlockSpec((1, tile_b), lambda i: (0, i)),
        compiler_params=pltpu.CompilerParams(
            dimension_semantics=("parallel",),                    # 2x on v7x (2 TCs)
        ),
    )(xt, w_col, b_smem)

    # Back to the PyTorch layout (B, 1); drop padding rows.
    return out[0, :B].reshape(B, O)


def init_params(key, in_features, out_features):
    # Deterministic init mimicking nn.Linear default: U(-k, k), k = 1/sqrt(in_features)
    kw, kb = jax.random.split(key)
    bound = 1.0 / jnp.sqrt(jnp.float32(in_features))
    w = jax.random.uniform(kw, (out_features, in_features), jnp.float32, -bound, bound)
    b = jax.random.uniform(kb, (out_features,), jnp.float32, -bound, bound)
    return w, b


if __name__ == "__main__":
    key = jax.random.PRNGKey(0)
    kx, kp, kx2 = jax.random.split(key, 3)

    # Small shape matching the module spec.
    batch = 8
    x = jax.random.normal(kx, (batch, INPUT_FEATURES), jnp.float32)
    w, b = init_params(kp, INPUT_FEATURES, OUTPUT_FEATURES)

    out = jax.block_until_ready(bayesian_linear_forward(x, w, b))
    ref = x @ w.T + b[None, :]
    assert out.shape == (batch, OUTPUT_FEATURES)
    assert jnp.allclose(out, ref, atol=1e-5, rtol=1e-5)

    # Larger, non-multiple batch to exercise the tiled parallel grid + padding path.
    big_batch = 1037
    x2 = jax.random.normal(kx2, (big_batch, INPUT_FEATURES), jnp.float32)
    out2 = jax.block_until_ready(bayesian_linear_forward(x2, w, b))
    ref2 = x2 @ w.T + b[None, :]
    assert out2.shape == (big_batch, OUTPUT_FEATURES)
    assert jnp.allclose(out2, ref2, atol=1e-4, rtol=1e-4)

    print("KERNEL_OK")
</pallas_src>

<mosaic_0001>
module attributes {stable_mosaic.version = 11 : i64} {
  func.func @_blr_kernel(%arg0: i32, %arg1: memref<13x128xf32, #tpu.memory_space<vmem>>, %arg2: memref<13x1xf32, #tpu.memory_space<vmem>>, %arg3: memref<1x1xf32, #tpu.memory_space<smem>>, %arg4: memref<1x128xf32, #tpu.memory_space<vmem>>) attributes {dimension_semantics = [#tpu.dimension_semantics<parallel>], iteration_bounds = array<i64: 1>, scalar_prefetch = 0 : i64, scratch_operands = 0 : i64, tpu.core_type = #tpu.core_type<tc>, window_params = [{transform_indices = @transform_0, window_bounds = array<i64: 13, 128>}, {pipeline_mode = #tpu.pipeline_mode<synchronous>, transform_indices = @transform_1, window_bounds = array<i64: 13, 1>}, {transform_indices = @transform_2, window_bounds = array<i64: 1, 1>}, {transform_indices = @transform_3, window_bounds = array<i64: 1, 128>}]} {
    %c0 = arith.constant 0 : index
    %c0_0 = arith.constant 0 : index
    %0 = vector.load %arg1[%c0, %c0_0] : memref<13x128xf32, #tpu.memory_space<vmem>>, vector<13x128xf32>
    %c0_1 = arith.constant 0 : index
    %c0_2 = arith.constant 0 : index
    %1 = vector.load %arg2[%c0_1, %c0_2] : memref<13x1xf32, #tpu.memory_space<vmem>>, vector<13x1xf32>
    %2 = vector.broadcast %1 : vector<13x1xf32> to vector<13x128xf32>
    %3 = arith.mulf %0, %2 : vector<13x128xf32>
    %cst = arith.constant dense<0.000000e+00> : vector<128xf32>
    %4 = vector.multi_reduction <add>, %3, %cst [0] : vector<13x128xf32> to vector<128xf32>
    %5 = vector.shape_cast %4 : vector<128xf32> to vector<1x128xf32>
    %c0_3 = arith.constant 0 : index
    %c0_4 = arith.constant 0 : index
    %6 = memref.load %arg3[%c0_3, %c0_4] : memref<1x1xf32, #tpu.memory_space<smem>>
    %7 = vector.broadcast %6 : f32 to vector<1x128xf32>
    %8 = arith.addf %5, %7 : vector<1x128xf32>
    %c0_5 = arith.constant 0 : index
    %c0_6 = arith.constant 0 : index
    %9 = vector.load %arg4[%c0_5, %c0_6] : memref<1x128xf32, #tpu.memory_space<vmem>>, vector<1x128xf32>
    tpu.vector_store %arg4[%c0_5, %c0_6], %8 {strides = array<i32>} : memref<1x128xf32, #tpu.memory_space<vmem>>, vector<1x128xf32>,
    return
  }
  func.func @transform_0(%arg0: i32) -> (i32, i32) {
    %c0_i32 = arith.constant 0 : i32
    %c0_i32_0 = arith.constant 0 : i32
    return %c0_i32, %arg0 : i32, i32
  }
  func.func @transform_1(%arg0: i32) -> (i32, i32) {
    %c0_i32 = arith.constant 0 : i32
    %c0_i32_0 = arith.constant 0 : i32
    %c0_i32_1 = arith.constant 0 : i32
    return %c0_i32, %c0_i32_0 : i32, i32
  }
  func.func @transform_2(%arg0: i32) -> (i32, i32) {
    %c0_i32 = arith.constant 0 : i32
    %c0_i32_0 = arith.constant 0 : i32
    %c0_i32_1 = arith.constant 0 : i32
    return %c0_i32, %c0_i32_0 : i32, i32
  }
  func.func @transform_3(%arg0: i32) -> (i32, i32) {
    %c0_i32 = arith.constant 0 : i32
    %c0_i32_0 = arith.constant 0 : i32
    return %c0_i32, %arg0 : i32, i32
  }
}

</mosaic_0001>

<bundles_post_ra>
// kernel: tpu_custom_call.1
= control target key start
LH: loop header
LB: loop body
LE: loop exit
PB: predicated region body
PF: predicated region fallthrough
CT: control target
= control target key end

     0   :  { %v90_v1 = vmov 0   ;;  %s130_s0 = inlined_call_operand.vmem [shape: f32[13,128], index: 0, kind: input, shape index: {}]   ;;  %s131_s1 = inlined_call_operand.vmem [shape: f32[13,1], index: 1, kind: input, shape index: {}]   ;;  %s132_s2 = inlined_call_operand.<no memory space> [shape: f32[1,1], index: 2, kind: input, shape index: {}]   ;;  %s133_s3 = inlined_call_operand.hbm [shape: f32[1,128], index: 3, kind: output, shape index: {}]  }
   0x1   :  { %v19_v0 = vld [vmem:[%s131_s1 + $0x8] sm:$0x1f]  ;;  %63 = vset.pattern.permute.xlu0 %v90_v1 }
   0x2   :  { %9 = vsyncpa [#allocation4], 0  ;;  %27 = vperm.xlu0 %63, %v19_v0   ;;  %v18_v2 = vld [vmem:[%s131_s1] sm:$0xff]  ;;  %v17_v4 = vld [vmem:[%s130_s0 + $0x8] sm:$0x1f]  ;;  %vm32_vm0 = vcmask 1044480   ;;  %v42_v16 = vstv %s132_s2 }
   0x3   :  { %v16_v6 = vld [vmem:[%s130_s0] sm:$0xff]  ;;  %s91_s21 = smov [#allocation3]   ;;  %s52_s0 = sshll.u32 %s133_s3, 4  ;;  %s53_s0 = int_to_ptr.hbm [resolvable:$true] %s52_s0 }
   0x4   :  { %s50_s22 = sshll.u32 %s91_s21, 4  ;;  %s51_s22 = int_to_ptr.vmem [resolvable:$true] %s50_s22 }
   0xa   :  { %22 = vperm.xlu0 %63, %v18_v2  }
  0x74   :  { %v28_v3 = vpop.permute.xlu0 %27 }
  0x75   :  { %v31_v5 = vmul.f32 %v28_v3, %v17_v4 }
  0x77   :  { %v33_v9 = vsel %vm32_vm0, %v31_v5, 0.0 }
  0x7c   :  { %v23_v7 = vpop.permute.xlu0 %22 }
  0x7d   :  { %v30_v8 = vmul.f32 %v23_v7, %v16_v6 }
  0x7f   :  { %v34_v10 = vadd.f32 %v33_v9, %v30_v8 }
  0x81   :  { %v35_v11 = vrot.slane %v34_v10, 4 }
  0x83   :  { %v36_v12 = vadd.f32 %v35_v11, %v34_v10 }
  0x85   :  { %v37_v13 = vrot.slane %v36_v12, 2 }
  0x87   :  { %v38_v14 = vadd.f32 %v37_v13, %v36_v12 }
  0x89   :  { %v39_v15 = vrot.slane %v38_v14, 1 }
  0x8b   :  { %v40_v17 = vadd.f32 %v39_v15, %v38_v14 }
  0x8d   :  { %v43_v18 = vadd.f32 %v42_v16, %v40_v17 }
  0x8f   :  { %44 = vst [vmem:[#allocation3] sm:$0x1] %v43_v18 }
  0x90   :  { %55 = dma.vmem_to_hbm [thread:$0]  %s51_s22, 16, %s53_s0, [#allocation4]  }
  0x91   :  { %88 = dma.done.wait [#allocation4], 16  }
  0x92   :  { %89 = vsyncadd [#allocation4], 4294967280 }
  0x93   :  { %60 = vsyncpa [#allocation4], 1 }

</bundles_post_ra>
